<compile_context>
chip_gen: v6e
topology: v6e:2x2x1
jax: 0.10.0
libtpu: 0.0.40
codegen_flags: <defaults>
</compile_context>

<pallas_src>
import jax
import jax.numpy as jnp
from jax import lax
from jax.experimental import pallas as pl
from jax.experimental.pallas import tpu as pltpu

EPS = 1e-5
TEMPERATURE = 20.0


def _round_up(x, m):
    return (x + m - 1) // m * m


def _vmem_budget_bytes(frac=0.75, fallback=64 * 2**20):
    """Generation-aware VMEM budget (v5e/v6e: 128 MiB, v7x: 64 MiB per TC)."""
    try:
        cap = int(pltpu.get_tpu_info().vmem_capacity_bytes)
    except Exception:
        cap = fallback  # conservative (v7x-sized) fallback
    return int(cap * frac)


def make_halo_masks(H, W, dtype):
    """(9, HW) validity masks for the 3x3 SAME-pad taps, tap-major (dy, dx)."""
    HW = H * W
    col = jnp.arange(HW, dtype=jnp.int32).reshape(1, HW)
    yy = col // W
    xx = col - yy * W
    rows = []
    for dy in (-1, 0, 1):
        for dx in (-1, 0, 1):
            valid = ((yy + dy >= 0) & (yy + dy < H)
                     & (xx + dx >= 0) & (xx + dx < W))
            rows.append(valid)
    return jnp.concatenate(rows, axis=0).astype(dtype)


# ----------------------------------------------------------------------------
# Fused refine kernel: conv3x3+BN+ReLU -> conv3x3+BN+ReLU -> optional seg scale
# ----------------------------------------------------------------------------
def fused_refine(x_flat, w1r, b1, w2r, b2, masks, seg_scale, H, W, compute_dtype):
    """x_flat: (N, Cin_p, HW) compute_dtype; seg_scale: (N, 1, HW) f32 or None.
    Returns (N, Cq_p, HW) refined (and seg-scaled) features, lane-dense."""
    N, Cin_p, HW = x_flat.shape
    Cmid_p = w1r.shape[0]
    Cq_p = w2r.shape[0]
    has_seg = seg_scale is not None

    # 3x3 tap offsets -> flattened lane shifts (shared by both conv layers).
    taps = [(dy, dx) for dy in (-1, 0, 1) for dx in (-1, 0, 1)]
    shifts = [(-(dy * W + dx)) % HW for dy, dx in taps]
    center = taps.index((0, 0))

    def conv3x3(x, w_ref, bias, mask_ref, col_ref, c):
        # Write the 9 rolled+masked taps straight into the VMEM im2col scratch,
        # then one MXU dot with K = 9*c.  Center tap: no roll, no mask multiply.
        for t, sh in enumerate(shifts):
            xs = x if sh == 0 else pltpu.roll(x, shift=sh, axis=1)
            if t != center:
                xs = xs * mask_ref[t, :]                 # zero SAME-pad halo
            col_ref[t * c:(t + 1) * c, :] = xs
        y = jnp.dot(w_ref[...], col_ref[...], preferred_element_type=jnp.float32)
        return jnp.maximum(y + bias, 0.0)                # BN scale folded into w

    def kernel(*refs):
        if has_seg:
            (x_ref, w1_ref, b1_ref, w2_ref, b2_ref, mask_ref, seg_ref,
             o_ref, col1_ref, col2_ref) = refs
        else:
            (x_ref, w1_ref, b1_ref, w2_ref, b2_ref, mask_ref,
             o_ref, col1_ref, col2_ref) = refs

        x = x_ref[0]                                              # (Cin_p, HW)
        h = conv3x3(x, w1_ref, b1_ref[...], mask_ref, col1_ref, Cin_p)
        h = h.astype(compute_dtype)                               # (Cmid_p, HW)
        y = conv3x3(h, w2_ref, b2_ref[...], mask_ref, col2_ref, Cmid_p)
        if has_seg:
            y = y * seg_ref[0]                                    # (1, HW) bcast
        o_ref[0] = y.astype(o_ref.dtype)

    in_specs = [
        pl.BlockSpec((1, Cin_p, HW), lambda n: (n, 0, 0)),
        pl.BlockSpec((Cmid_p, 9 * Cin_p), lambda n: (0, 0)),
        pl.BlockSpec((Cmid_p, 1), lambda n: (0, 0)),
        pl.BlockSpec((Cq_p, 9 * Cmid_p), lambda n: (0, 0)),
        pl.BlockSpec((Cq_p, 1), lambda n: (0, 0)),
        pl.BlockSpec((9, HW), lambda n: (0, 0)),          # halo masks, resident
    ]
    args = [x_flat, w1r, b1, w2r, b2, masks]
    if has_seg:
        in_specs.append(pl.BlockSpec((1, 1, HW), lambda n: (n, 0, 0)))
        args.append(seg_scale)

    return pl.pallas_call(
        kernel,
        out_shape=jax.ShapeDtypeStruct((N, Cq_p, HW), compute_dtype),
        grid=(N,),
        in_specs=in_specs,
        out_specs=pl.BlockSpec((1, Cq_p, HW), lambda n: (n, 0, 0)),
        scratch_shapes=[pltpu.VMEM((9 * Cin_p, HW), compute_dtype),
                        pltpu.VMEM((9 * Cmid_p, HW), compute_dtype)],
        compiler_params=pltpu.CompilerParams(dimension_semantics=("parallel",)),
    )(*args)


# ----------------------------------------------------------------------------
# Row-tiled similarity + softmax kernel
# ----------------------------------------------------------------------------
def _choose_row_tile(HW, Cp, in_bytes, out_bytes, budget):
    """Largest lane-aligned (multiple-of-128) divisor of HW whose double-buffered
    blocks fit the VMEM budget; never falls back to a full (HW, HW) block unless
    HW itself is smaller than one lane tile."""
    usable = int(budget * 0.8)                 # headroom for scalars / scratch
    resident = 2 * Cp * HW * in_bytes          # double-buffered resident ir block
    smallest = None
    for cand in (4096, 2048, 1024, 512, 256, 128):
        if cand <= HW and HW % cand == 0:
            need = resident + 2 * cand * (HW * out_bytes + Cp * in_bytes)
            if need <= usable:
                return cand
            smallest = cand
    if smallest is not None:
        return smallest                        # 128 = structural minimum tile
    return HW                                  # HW < 128: single full block


def disparity_softmax(vis_p, ir_p, temperature=TEMPERATURE, out_dtype=jnp.float32):
    """vis_p / ir_p: (B, Cq_p, HW) lane-dense, channel-padded features.
    Returns softmax((vis^T ir) * T, axis=-1) of shape (B, HW, HW)."""
    B, Cp, HW = vis_p.shape
    in_bytes = jnp.dtype(vis_p.dtype).itemsize
    out_bytes = jnp.dtype(out_dtype).itemsize
    budget = _vmem_budget_bytes()
    tq = _choose_row_tile(HW, Cp, in_bytes, out_bytes, budget)

    def kernel(v_ref, i_ref, o_ref):
        # Fold the temperature into the tiny (Cp, tq) vis tile; contract on dim 0
        # of both operands so no transpose / lane-sparse intermediate is built.
        v = v_ref[0] * temperature
        sim = lax.dot_general(v, i_ref[0], (((0,), (0,)), ((), ())),
                              preferred_element_type=jnp.float32)   # (tq, HW)
        m = jnp.max(sim, axis=-1, keepdims=True)
        e = jnp.exp(sim - m)
        denom = jnp.sum(e, axis=-1, keepdims=True)
        # approx reciprocal runs on the otherwise-idle EUP; rows sum to 1 only to
        # ~1e-3 relative accuracy (documented, acceptable downstream).
        o_ref[0] = (e * pl.reciprocal(denom, approx=True)).astype(o_ref.dtype)

    return pl.pallas_call(
        kernel,
        out_shape=jax.ShapeDtypeStruct((B, HW, HW), out_dtype),
        grid=(B, HW // tq),
        in_specs=[
            pl.BlockSpec((1, Cp, tq), lambda b, q: (b, 0, q)),
            pl.BlockSpec((1, Cp, HW), lambda b, q: (b, 0, 0)),
        ],
        out_specs=pl.BlockSpec((1, tq, HW), lambda b, q: (b, q, 0)),
        compiler_params=pltpu.CompilerParams(
            dimension_semantics=("parallel", "parallel"),
            vmem_limit_bytes=int(budget)),
    )(vis_p, ir_p)


# ----------------------------------------------------------------------------
# Glue (plain JAX): bilinear resize (align_corners=True), parameter packing
# ----------------------------------------------------------------------------
def resize_bilinear_align_corners(x, out_h, out_w):
    """F.interpolate(..., mode='bilinear', align_corners=True).  x: (B, C, h, w)."""
    B, C, in_h, in_w = x.shape
    ys = jnp.arange(out_h, dtype=jnp.float32) * ((in_h - 1) / max(out_h - 1, 1))
    xs = jnp.arange(out_w, dtype=jnp.float32) * ((in_w - 1) / max(out_w - 1, 1))
    y0 = jnp.floor(ys).astype(jnp.int32)
    x0 = jnp.floor(xs).astype(jnp.int32)
    y1 = jnp.minimum(y0 + 1, in_h - 1)
    x1 = jnp.minimum(x0 + 1, in_w - 1)
    wy = (ys - y0.astype(jnp.float32))[:, None]
    wx = (xs - x0.astype(jnp.float32))[None, :]
    g = lambda yy, xx: x[:, :, yy, :][:, :, :, xx]
    top = g(y0, x0) * (1.0 - wx) + g(y0, x1) * wx
    bot = g(y1, x0) * (1.0 - wx) + g(y1, x1) * wx
    return top * (1.0 - wy) + bot * wy


def init_params(key, in_channels):
    c_in, c_mid, c_q = in_channels, in_channels // 2, in_channels // 4
    ks = jax.random.split(key, 12)
    return {
        "w1": 0.2 * jax.random.normal(ks[0], (3, 3, c_in, c_mid), jnp.float32),
        "b1": 0.1 * jax.random.normal(ks[1], (c_mid,), jnp.float32),
        "gamma1": 1.0 + 0.1 * jax.random.normal(ks[2], (c_mid,), jnp.float32),
        "beta1": 0.1 * jax.random.normal(ks[3], (c_mid,), jnp.float32),
        "mean1": 0.1 * jax.random.normal(ks[4], (c_mid,), jnp.float32),
        "var1": jax.random.uniform(ks[5], (c_mid,), jnp.float32, 0.5, 1.5),
        "w2": 0.2 * jax.random.normal(ks[6], (3, 3, c_mid, c_q), jnp.float32),
        "b2": 0.1 * jax.random.normal(ks[7], (c_q,), jnp.float32),
        "gamma2": 1.0 + 0.1 * jax.random.normal(ks[8], (c_q,), jnp.float32),
        "beta2": 0.1 * jax.random.normal(ks[9], (c_q,), jnp.float32),
        "mean2": 0.1 * jax.random.normal(ks[10], (c_q,), jnp.float32),
        "var2": jax.random.uniform(ks[11], (c_q,), jnp.float32, 0.5, 1.5),
    }


def fold_and_pack_params(p, compute_dtype=jnp.float32):
    """Fold BN (scale into the weights, shift into the bias) and pack weights for
    the (C, HW) kernel layout, zero-padding channel dims to the sublane tile
    (8 rows for f32, 16 for bf16)."""
    c_in, c_mid = p["w1"].shape[2], p["w1"].shape[3]
    c_q = p["w2"].shape[3]
    pad_to = 8 if jnp.dtype(compute_dtype).itemsize == 4 else 16
    cin_p, cmid_p, cq_p = (_round_up(c, pad_to) for c in (c_in, c_mid, c_q))

    s1 = p["gamma1"] / jnp.sqrt(p["var1"] + EPS)
    bias1 = (p["b1"] - p["mean1"]) * s1 + p["beta1"]
    s2 = p["gamma2"] / jnp.sqrt(p["var2"] + EPS)
    bias2 = (p["b2"] - p["mean2"]) * s2 + p["beta2"]

    def pack_w(w, scale, cin, cin_pad, cout, cout_pad):
        # HWIO (3,3,cin,cout) -> (cout_pad, 9*cin_pad); column order matches the
        # in-kernel im2col stacking (tap-major, channel-minor).  BN scale folded.
        wt = jnp.transpose(w, (3, 0, 1, 2)) * scale[:, None, None, None]
        wt = jnp.pad(wt, ((0, cout_pad - cout), (0, 0), (0, 0),
                          (0, cin_pad - cin)))
        return wt.reshape(cout_pad, 9 * cin_pad).astype(compute_dtype)

    def pack_b(v, c, c_pad):
        return jnp.pad(v, (0, c_pad - c)).reshape(c_pad, 1).astype(jnp.float32)

    return {
        "w1r": pack_w(p["w1"], s1, c_in, cin_p, c_mid, cmid_p),
        "b1": pack_b(bias1, c_mid, cmid_p),
        "w2r": pack_w(p["w2"], s2, c_mid, cmid_p, c_q, cq_p),
        "b2": pack_b(bias2, c_q, cq_p),
        "dims": (cin_p, cmid_p, cq_p), "cq": c_q,
        "dtype": compute_dtype,
    }


# ----------------------------------------------------------------------------
# Forward pass (matches DisparityModule.forward)
# ----------------------------------------------------------------------------
def disparity_module_forward(packed, vis_feat, ir_feat, seg_mask=None,
                             disp_dtype=jnp.float32):
    compute_dtype = packed["dtype"]
    B, Cin, H, W = vis_feat.shape
    HW = H * W
    Cin_p = packed["dims"][0]
    Cq = packed["cq"]

    # shared `refine` weights -> run vis & ir stacked on the batch axis.
    feats = jnp.concatenate([vis_feat, ir_feat], axis=0).astype(compute_dtype)
    feats = feats.reshape(2 * B, Cin, HW)                # NCHW -> (N, C, HW)
    if Cin_p != Cin:
        feats = jnp.pad(feats, ((0, 0), (0, Cin_p - Cin), (0, 0)))

    masks = make_halo_masks(H, W, compute_dtype)

    seg_scale = None
    if seg_mask is not None:
        seg = resize_bilinear_align_corners(seg_mask.astype(jnp.float32), H, W)
        seg = (1.0 + 0.3 * seg).reshape(B, 1, HW)        # fold affine outside
        seg_scale = jnp.concatenate([seg, seg], axis=0)  # same mask for vis & ir

    refined = fused_refine(feats, packed["w1r"], packed["b1"],
                           packed["w2r"], packed["b2"], masks, seg_scale,
                           H, W, compute_dtype)          # (2B, Cq_p, HW)
    vis_p, ir_p = refined[:B], refined[B:]

    disp = disparity_softmax(vis_p, ir_p, out_dtype=disp_dtype)   # (B, HW, HW)
    disparity_matrix = disp.reshape(B, HW, H, W)

    vis_out = vis_p[:, :Cq, :].reshape(B, Cq, H, W)      # already NCHW
    ir_out = ir_p[:, :Cq, :].reshape(B, Cq, H, W)
    return disparity_matrix, vis_out, ir_out


# ----------------------------------------------------------------------------
# Pure-JAX reference (for verification)
# ----------------------------------------------------------------------------
def reference_forward(p, vis_feat, ir_feat, seg_mask=None):
    def block(x, w, b, gamma, beta, mean, var):
        y = lax.conv_general_dilated(x, w, (1, 1), "SAME",
                                     dimension_numbers=("NHWC", "HWIO", "NHWC")) + b
        y = (y - mean) / jnp.sqrt(var + EPS) * gamma + beta
        return jnp.maximum(y, 0.0)

    def refine(x_nchw):
        x = jnp.transpose(x_nchw, (0, 2, 3, 1)).astype(jnp.float32)
        y = block(x, p["w1"], p["b1"], p["gamma1"], p["beta1"], p["mean1"], p["var1"])
        y = block(y, p["w2"], p["b2"], p["gamma2"], p["beta2"], p["mean2"], p["var2"])
        return y

    vr, irr = refine(vis_feat), refine(ir_feat)
    B, H, W, Cq = vr.shape
    if seg_mask is not None:
        seg = resize_bilinear_align_corners(seg_mask.astype(jnp.float32), H, W)
        seg = jnp.transpose(seg, (0, 2, 3, 1))
        vr = vr * (1.0 + 0.3 * seg)
        irr = irr * (1.0 + 0.3 * seg)
    vf = vr.reshape(B, H * W, Cq)
    irf = irr.reshape(B, H * W, Cq)
    sim = jnp.einsum("bic,bjc->bij", vf, irf) * TEMPERATURE
    disp = jax.nn.softmax(sim, axis=-1).reshape(B, H * W, H, W)
    return disp, jnp.transpose(vr, (0, 3, 1, 2)), jnp.transpose(irr, (0, 3, 1, 2))


if __name__ == "__main__":
    key = jax.random.PRNGKey(0)
    k_param, k_vis, k_ir, k_seg = jax.random.split(key, 4)
    in_channels, B, H, W = 8, 2, 16, 16

    raw = init_params(k_param, in_channels)

    vis = jax.random.normal(k_vis, (B, in_channels, H, W), jnp.float32)
    ir = jax.random.normal(k_ir, (B, in_channels, H, W), jnp.float32)
    seg = jax.random.uniform(k_seg, (B, 1, 8, 8), jnp.float32)

    # --- f32 path (default): exact PyTorch-module semantics (inference BN) ---
    packed = fold_and_pack_params(raw, jnp.float32)

    disp, vr, irr = jax.block_until_ready(
        disparity_module_forward(packed, vis, ir, seg))
    assert disp.shape == (B, H * W, H, W)
    assert vr.shape == (B, in_channels // 4, H, W)
    assert irr.shape == (B, in_channels // 4, H, W)

    disp_r, vr_r, irr_r = reference_forward(raw, vis, ir, seg)
    for name, a, b in (("disparity", disp, disp_r),
                       ("vis_refined", vr, vr_r),
                       ("ir_refined", irr, irr_r)):
        err = float(jnp.max(jnp.abs(a - b)))
        if err > 5e-3:
            raise AssertionError(f"{name} mismatch vs reference: max abs err {err}")

    # also exercise / verify the seg_mask=None branch
    disp_n, vr_n, irr_n = jax.block_until_ready(
        disparity_module_forward(packed, vis, ir, None))
    disp_nr, vr_nr, irr_nr = reference_forward(raw, vis, ir, None)
    for name, a, b in (("disparity(no_seg)", disp_n, disp_nr),
                       ("vis_refined(no_seg)", vr_n, vr_nr),
                       ("ir_refined(no_seg)", irr_n, irr_nr)):
        err = float(jnp.max(jnp.abs(a - b)))
        if err > 5e-3:
            raise AssertionError(f"{name} mismatch vs reference: max abs err {err}")

    # --- bf16 fast path (production dtype): smoke-test only.  No strict
    # tolerance: the T=20 softmax is intentionally sharp, so bf16 logits shift
    # the distribution; row-stochasticity is still checked loosely. ---
    packed_bf16 = fold_and_pack_params(raw, jnp.bfloat16)
    disp_b, vr_b, irr_b = jax.block_until_ready(
        disparity_module_forward(packed_bf16, vis, ir, seg,
                                 disp_dtype=jnp.bfloat16))
    assert disp_b.shape == (B, H * W, H, W)
    row_sums = disp_b.astype(jnp.float32).reshape(B, H * W, H * W).sum(-1)
    assert bool(jnp.all(jnp.isfinite(row_sums)))
    assert float(jnp.max(jnp.abs(row_sums - 1.0))) < 5e-2

    print("KERNEL_OK")
</pallas_src>

<mosaic_0001>
module attributes {stable_mosaic.version = 11 : i64} {
  func.func @kernel(%arg0: i32, %arg1: memref<1x8x256xf32, #tpu.memory_space<vmem>>, %arg2: memref<8x72xf32, #tpu.memory_space<vmem>>, %arg3: memref<8x1xf32, #tpu.memory_space<vmem>>, %arg4: memref<8x72xf32, #tpu.memory_space<vmem>>, %arg5: memref<8x1xf32, #tpu.memory_space<vmem>>, %arg6: memref<9x256xf32, #tpu.memory_space<vmem>>, %arg7: memref<1x1x256xf32, #tpu.memory_space<vmem>>, %arg8: memref<1x8x256xf32, #tpu.memory_space<vmem>>, %arg9: memref<72x256xf32, #tpu.memory_space<vmem>>, %arg10: memref<72x256xf32, #tpu.memory_space<vmem>>) attributes {dimension_semantics = [#tpu.dimension_semantics<parallel>], iteration_bounds = array<i64: 4>, scalar_prefetch = 0 : i64, scratch_operands = 2 : i64, tpu.core_type = #tpu.core_type<tc>, window_params = [{transform_indices = @transform_0, window_bounds = array<i64: 1, 8, 256>}, {pipeline_mode = #tpu.pipeline_mode<synchronous>, transform_indices = @transform_1, window_bounds = array<i64: 8, 72>}, {pipeline_mode = #tpu.pipeline_mode<synchronous>, transform_indices = @transform_2, window_bounds = array<i64: 8, 1>}, {pipeline_mode = #tpu.pipeline_mode<synchronous>, transform_indices = @transform_3, window_bounds = array<i64: 8, 72>}, {pipeline_mode = #tpu.pipeline_mode<synchronous>, transform_indices = @transform_4, window_bounds = array<i64: 8, 1>}, {pipeline_mode = #tpu.pipeline_mode<synchronous>, transform_indices = @transform_5, window_bounds = array<i64: 9, 256>}, {transform_indices = @transform_6, window_bounds = array<i64: 1, 1, 256>}, {transform_indices = @transform_7, window_bounds = array<i64: 1, 8, 256>}]} {
    %c0 = arith.constant 0 : index
    %c0_0 = arith.constant 0 : index
    %c0_1 = arith.constant 0 : index
    %0 = vector.load %arg1[%c0, %c0_0, %c0_1] : memref<1x8x256xf32, #tpu.memory_space<vmem>>, vector<1x8x256xf32>
    %1 = vector.shape_cast %0 : vector<1x8x256xf32> to vector<8x256xf32>
    %c0_2 = arith.constant 0 : index
    %c0_3 = arith.constant 0 : index
    %2 = vector.load %arg3[%c0_2, %c0_3] : memref<8x1xf32, #tpu.memory_space<vmem>>, vector<8x1xf32>
    %c17_i32 = arith.constant 17 : i32
    %3 = tpu.dynamic_rotate %1 by %c17_i32 dim 1 : vector<8x256xf32>, i32 -> vector<8x256xf32>
    %c0_4 = arith.constant 0 : index
    %c0_5 = arith.constant 0 : index
    %4 = vector.load %arg6[%c0_4, %c0_5] : memref<9x256xf32, #tpu.memory_space<vmem>>, vector<1x256xf32>
    %5 = vector.shape_cast %4 : vector<1x256xf32> to vector<256xf32>
    %6 = vector.shape_cast %5 : vector<256xf32> to vector<1x256xf32>
    %7 = vector.broadcast %6 : vector<1x256xf32> to vector<8x256xf32>
    %8 = arith.mulf %3, %7 : vector<8x256xf32>
    %c0_6 = arith.constant 0 : index
    %c0_7 = arith.constant 0 : index
    %9 = vector.load %arg9[%c0_6, %c0_7] : memref<72x256xf32, #tpu.memory_space<vmem>>, vector<8x256xf32>
    tpu.vector_store %arg9[%c0_6, %c0_7], %8 {strides = array<i32>} : memref<72x256xf32, #tpu.memory_space<vmem>>, vector<8x256xf32>,
    %c16_i32 = arith.constant 16 : i32
    %10 = tpu.dynamic_rotate %1 by %c16_i32 dim 1 : vector<8x256xf32>, i32 -> vector<8x256xf32>
    %c1 = arith.constant 1 : index
    %c0_8 = arith.constant 0 : index
    %11 = vector.load %arg6[%c1, %c0_8] : memref<9x256xf32, #tpu.memory_space<vmem>>, vector<1x256xf32>
    %12 = vector.shape_cast %11 : vector<1x256xf32> to vector<256xf32>
    %13 = vector.shape_cast %12 : vector<256xf32> to vector<1x256xf32>
    %14 = vector.broadcast %13 : vector<1x256xf32> to vector<8x256xf32>
    %15 = arith.mulf %10, %14 : vector<8x256xf32>
    %c8 = arith.constant 8 : index
    %c0_9 = arith.constant 0 : index
    %16 = vector.load %arg9[%c8, %c0_9] : memref<72x256xf32, #tpu.memory_space<vmem>>, vector<8x256xf32>
    tpu.vector_store %arg9[%c8, %c0_9], %15 {strides = array<i32>} : memref<72x256xf32, #tpu.memory_space<vmem>>, vector<8x256xf32>,
    %c15_i32 = arith.constant 15 : i32
    %17 = tpu.dynamic_rotate %1 by %c15_i32 dim 1 : vector<8x256xf32>, i32 -> vector<8x256xf32>
    %c2 = arith.constant 2 : index
    %c0_10 = arith.constant 0 : index
    %18 = vector.load %arg6[%c2, %c0_10] : memref<9x256xf32, #tpu.memory_space<vmem>>, vector<1x256xf32>
    %19 = vector.shape_cast %18 : vector<1x256xf32> to vector<256xf32>
    %20 = vector.shape_cast %19 : vector<256xf32> to vector<1x256xf32>
    %21 = vector.broadcast %20 : vector<1x256xf32> to vector<8x256xf32>
    %22 = arith.mulf %17, %21 : vector<8x256xf32>
    %c16 = arith.constant 16 : index
    %c0_11 = arith.constant 0 : index
    %23 = vector.load %arg9[%c16, %c0_11] : memref<72x256xf32, #tpu.memory_space<vmem>>, vector<8x256xf32>
    tpu.vector_store %arg9[%c16, %c0_11], %22 {strides = array<i32>} : memref<72x256xf32, #tpu.memory_space<vmem>>, vector<8x256xf32>,
    %c1_i32 = arith.constant 1 : i32
    %24 = tpu.dynamic_rotate %1 by %c1_i32 dim 1 : vector<8x256xf32>, i32 -> vector<8x256xf32>
    %c3 = arith.constant 3 : index
    %c0_12 = arith.constant 0 : index
    %25 = vector.load %arg6[%c3, %c0_12] : memref<9x256xf32, #tpu.memory_space<vmem>>, vector<1x256xf32>
    %26 = vector.shape_cast %25 : vector<1x256xf32> to vector<256xf32>
    %27 = vector.shape_cast %26 : vector<256xf32> to vector<1x256xf32>
    %28 = vector.broadcast %27 : vector<1x256xf32> to vector<8x256xf32>
    %29 = arith.mulf %24, %28 : vector<8x256xf32>
    %c24 = arith.constant 24 : index
    %c0_13 = arith.constant 0 : index
    %30 = vector.load %arg9[%c24, %c0_13] : memref<72x256xf32, #tpu.memory_space<vmem>>, vector<8x256xf32>
    tpu.vector_store %arg9[%c24, %c0_13], %29 {strides = array<i32>} : memref<72x256xf32, #tpu.memory_space<vmem>>, vector<8x256xf32>,
    %c32 = arith.constant 32 : index
    %c0_14 = arith.constant 0 : index
    %31 = vector.load %arg9[%c32, %c0_14] : memref<72x256xf32, #tpu.memory_space<vmem>>, vector<8x256xf32>
    tpu.vector_store %arg9[%c32, %c0_14], %1 {strides = array<i32>} : memref<72x256xf32, #tpu.memory_space<vmem>>, vector<8x256xf32>,
    %c255_i32 = arith.constant 255 : i32
    %32 = tpu.dynamic_rotate %1 by %c255_i32 dim 1 : vector<8x256xf32>, i32 -> vector<8x256xf32>
    %c5 = arith.constant 5 : index
    %c0_15 = arith.constant 0 : index
    %33 = vector.load %arg6[%c5, %c0_15] : memref<9x256xf32, #tpu.memory_space<vmem>>, vector<1x256xf32>
    %34 = vector.shape_cast %33 : vector<1x256xf32> to vector<256xf32>
    %35 = vector.shape_cast %34 : vector<256xf32> to vector<1x256xf32>
    %36 = vector.broadcast %35 : vector<1x256xf32> to vector<8x256xf32>
    %37 = arith.mulf %32, %36 : vector<8x256xf32>
    %c40 = arith.constant 40 : index
    %c0_16 = arith.constant 0 : index
    %38 = vector.load %arg9[%c40, %c0_16] : memref<72x256xf32, #tpu.memory_space<vmem>>, vector<8x256xf32>
    tpu.vector_store %arg9[%c40, %c0_16], %37 {strides = array<i32>} : memref<72x256xf32, #tpu.memory_space<vmem>>, vector<8x256xf32>,
    %c241_i32 = arith.constant 241 : i32
    %39 = tpu.dynamic_rotate %1 by %c241_i32 dim 1 : vector<8x256xf32>, i32 -> vector<8x256xf32>
    %c6 = arith.constant 6 : index
    %c0_17 = arith.constant 0 : index
    %40 = vector.load %arg6[%c6, %c0_17] : memref<9x256xf32, #tpu.memory_space<vmem>>, vector<1x256xf32>
    %41 = vector.shape_cast %40 : vector<1x256xf32> to vector<256xf32>
    %42 = vector.shape_cast %41 : vector<256xf32> to vector<1x256xf32>
    %43 = vector.broadcast %42 : vector<1x256xf32> to vector<8x256xf32>
    %44 = arith.mulf %39, %43 : vector<8x256xf32>
    %c48 = arith.constant 48 : index
    %c0_18 = arith.constant 0 : index
    %45 = vector.load %arg9[%c48, %c0_18] : memref<72x256xf32, #tpu.memory_space<vmem>>, vector<8x256xf32>
    tpu.vector_store %arg9[%c48, %c0_18], %44 {strides = array<i32>} : memref<72x256xf32, #tpu.memory_space<vmem>>, vector<8x256xf32>,
    %c240_i32 = arith.constant 240 : i32
    %46 = tpu.dynamic_rotate %1 by %c240_i32 dim 1 : vector<8x256xf32>, i32 -> vector<8x256xf32>
    %c7 = arith.constant 7 : index
    %c0_19 = arith.constant 0 : index
    %47 = vector.load %arg6[%c7, %c0_19] : memref<9x256xf32, #tpu.memory_space<vmem>>, vector<1x256xf32>
    %48 = vector.shape_cast %47 : vector<1x256xf32> to vector<256xf32>
    %49 = vector.shape_cast %48 : vector<256xf32> to vector<1x256xf32>
    %50 = vector.broadcast %49 : vector<1x256xf32> to vector<8x256xf32>
    %51 = arith.mulf %46, %50 : vector<8x256xf32>
    %c56 = arith.constant 56 : index
    %c0_20 = arith.constant 0 : index
    %52 = vector.load %arg9[%c56, %c0_20] : memref<72x256xf32, #tpu.memory_space<vmem>>, vector<8x256xf32>
    tpu.vector_store %arg9[%c56, %c0_20], %51 {strides = array<i32>} : memref<72x256xf32, #tpu.memory_space<vmem>>, vector<8x256xf32>,
    %c239_i32 = arith.constant 239 : i32
    %53 = tpu.dynamic_rotate %1 by %c239_i32 dim 1 : vector<8x256xf32>, i32 -> vector<8x256xf32>
    %c8_21 = arith.constant 8 : index
    %c0_22 = arith.constant 0 : index
    %54 = vector.load %arg6[%c8_21, %c0_22] : memref<9x256xf32, #tpu.memory_space<vmem>>, vector<1x256xf32>
    %55 = vector.shape_cast %54 : vector<1x256xf32> to vector<256xf32>
    %56 = vector.shape_cast %55 : vector<256xf32> to vector<1x256xf32>
    %57 = vector.broadcast %56 : vector<1x256xf32> to vector<8x256xf32>
    %58 = arith.mulf %53, %57 : vector<8x256xf32>
    %c64 = arith.constant 64 : index
    %c0_23 = arith.constant 0 : index
    %59 = vector.load %arg9[%c64, %c0_23] : memref<72x256xf32, #tpu.memory_space<vmem>>, vector<8x256xf32>
    tpu.vector_store %arg9[%c64, %c0_23], %58 {strides = array<i32>} : memref<72x256xf32, #tpu.memory_space<vmem>>, vector<8x256xf32>,
    %c0_24 = arith.constant 0 : index
    %c0_25 = arith.constant 0 : index
    %60 = vector.load %arg2[%c0_24, %c0_25] : memref<8x72xf32, #tpu.memory_space<vmem>>, vector<8x72xf32>
    %c0_26 = arith.constant 0 : index
    %c0_27 = arith.constant 0 : index
    %61 = vector.load %arg9[%c0_26, %c0_27] : memref<72x256xf32, #tpu.memory_space<vmem>>, vector<72x256xf32>
    %cst = arith.constant dense<0.000000e+00> : vector<8x256xf32>
    %62 = tpu.matmul %60, %61, %cst {dimension_numbers = #tpu.dot_dimension_numbers<[1], [0], [0], [1], [0, 0, 1, 1], [], []>} : vector<8x72xf32>, vector<72x256xf32>, vector<8x256xf32> -> vector<8x256xf32>
    %63 = vector.broadcast %2 : vector<8x1xf32> to vector<8x256xf32>
    %64 = arith.addf %62, %63 : vector<8x256xf32>
    %cst_28 = arith.constant 0.000000e+00 : f32
    %65 = vector.broadcast %cst_28 : f32 to vector<8x256xf32>
    %66 = arith.maximumf %64, %65 : vector<8x256xf32>
    %c0_29 = arith.constant 0 : index
    %c0_30 = arith.constant 0 : index
    %67 = vector.load %arg5[%c0_29, %c0_30] : memref<8x1xf32, #tpu.memory_space<vmem>>, vector<8x1xf32>
    %c17_i32_31 = arith.constant 17 : i32
    %68 = tpu.dynamic_rotate %66 by %c17_i32_31 dim 1 : vector<8x256xf32>, i32 -> vector<8x256xf32>
    %c0_32 = arith.constant 0 : index
    %c0_33 = arith.constant 0 : index
    %69 = vector.load %arg6[%c0_32, %c0_33] : memref<9x256xf32, #tpu.memory_space<vmem>>, vector<1x256xf32>
    %70 = vector.shape_cast %69 : vector<1x256xf32> to vector<256xf32>
    %71 = vector.shape_cast %70 : vector<256xf32> to vector<1x256xf32>
    %72 = vector.broadcast %71 : vector<1x256xf32> to vector<8x256xf32>
    %73 = arith.mulf %68, %72 : vector<8x256xf32>
    %c0_34 = arith.constant 0 : index
    %c0_35 = arith.constant 0 : index
    %74 = vector.load %arg10[%c0_34, %c0_35] : memref<72x256xf32, #tpu.memory_space<vmem>>, vector<8x256xf32>
    tpu.vector_store %arg10[%c0_34, %c0_35], %73 {strides = array<i32>} : memref<72x256xf32, #tpu.memory_space<vmem>>, vector<8x256xf32>,
    %c16_i32_36 = arith.constant 16 : i32
    %75 = tpu.dynamic_rotate %66 by %c16_i32_36 dim 1 : vector<8x256xf32>, i32 -> vector<8x256xf32>
    %c1_37 = arith.constant 1 : index
    %c0_38 = arith.constant 0 : index
    %76 = vector.load %arg6[%c1_37, %c0_38] : memref<9x256xf32, #tpu.memory_space<vmem>>, vector<1x256xf32>
    %77 = vector.shape_cast %76 : vector<1x256xf32> to vector<256xf32>
    %78 = vector.shape_cast %77 : vector<256xf32> to vector<1x256xf32>
    %79 = vector.broadcast %78 : vector<1x256xf32> to vector<8x256xf32>
    %80 = arith.mulf %75, %79 : vector<8x256xf32>
    %c8_39 = arith.constant 8 : index
    %c0_40 = arith.constant 0 : index
    %81 = vector.load %arg10[%c8_39, %c0_40] : memref<72x256xf32, #tpu.memory_space<vmem>>, vector<8x256xf32>
    tpu.vector_store %arg10[%c8_39, %c0_40], %80 {strides = array<i32>} : memref<72x256xf32, #tpu.memory_space<vmem>>, vector<8x256xf32>,
    %c15_i32_41 = arith.constant 15 : i32
    %82 = tpu.dynamic_rotate %66 by %c15_i32_41 dim 1 : vector<8x256xf32>, i32 -> vector<8x256xf32>
    %c2_42 = arith.constant 2 : index
    %c0_43 = arith.constant 0 : index
    %83 = vector.load %arg6[%c2_42, %c0_43] : memref<9x256xf32, #tpu.memory_space<vmem>>, vector<1x256xf32>
    %84 = vector.shape_cast %83 : vector<1x256xf32> to vector<256xf32>
    %85 = vector.shape_cast %84 : vector<256xf32> to vector<1x256xf32>
    %86 = vector.broadcast %85 : vector<1x256xf32> to vector<8x256xf32>
    %87 = arith.mulf %82, %86 : vector<8x256xf32>
    %c16_44 = arith.constant 16 : index
    %c0_45 = arith.constant 0 : index
    %88 = vector.load %arg10[%c16_44, %c0_45] : memref<72x256xf32, #tpu.memory_space<vmem>>, vector<8x256xf32>
    tpu.vector_store %arg10[%c16_44, %c0_45], %87 {strides = array<i32>} : memref<72x256xf32, #tpu.memory_space<vmem>>, vector<8x256xf32>,
    %c1_i32_46 = arith.constant 1 : i32
    %89 = tpu.dynamic_rotate %66 by %c1_i32_46 dim 1 : vector<8x256xf32>, i32 -> vector<8x256xf32>
    %c3_47 = arith.constant 3 : index
    %c0_48 = arith.constant 0 : index
    %90 = vector.load %arg6[%c3_47, %c0_48] : memref<9x256xf32, #tpu.memory_space<vmem>>, vector<1x256xf32>
    %91 = vector.shape_cast %90 : vector<1x256xf32> to vector<256xf32>
    %92 = vector.shape_cast %91 : vector<256xf32> to vector<1x256xf32>
    %93 = vector.broadcast %92 : vector<1x256xf32> to vector<8x256xf32>
    %94 = arith.mulf %89, %93 : vector<8x256xf32>
    %c24_49 = arith.constant 24 : index
    %c0_50 = arith.constant 0 : index
    %95 = vector.load %arg10[%c24_49, %c0_50] : memref<72x256xf32, #tpu.memory_space<vmem>>, vector<8x256xf32>
    tpu.vector_store %arg10[%c24_49, %c0_50], %94 {strides = array<i32>} : memref<72x256xf32, #tpu.memory_space<vmem>>, vector<8x256xf32>,
    %c32_51 = arith.constant 32 : index
    %c0_52 = arith.constant 0 : index
    %96 = vector.load %arg10[%c32_51, %c0_52] : memref<72x256xf32, #tpu.memory_space<vmem>>, vector<8x256xf32>
    tpu.vector_store %arg10[%c32_51, %c0_52], %66 {strides = array<i32>} : memref<72x256xf32, #tpu.memory_space<vmem>>, vector<8x256xf32>,
    %c255_i32_53 = arith.constant 255 : i32
    %97 = tpu.dynamic_rotate %66 by %c255_i32_53 dim 1 : vector<8x256xf32>, i32 -> vector<8x256xf32>
    %c5_54 = arith.constant 5 : index
    %c0_55 = arith.constant 0 : index
    %98 = vector.load %arg6[%c5_54, %c0_55] : memref<9x256xf32, #tpu.memory_space<vmem>>, vector<1x256xf32>
    %99 = vector.shape_cast %98 : vector<1x256xf32> to vector<256xf32>
    %100 = vector.shape_cast %99 : vector<256xf32> to vector<1x256xf32>
    %101 = vector.broadcast %100 : vector<1x256xf32> to vector<8x256xf32>
    %102 = arith.mulf %97, %101 : vector<8x256xf32>
    %c40_56 = arith.constant 40 : index
    %c0_57 = arith.constant 0 : index
    %103 = vector.load %arg10[%c40_56, %c0_57] : memref<72x256xf32, #tpu.memory_space<vmem>>, vector<8x256xf32>
    tpu.vector_store %arg10[%c40_56, %c0_57], %102 {strides = array<i32>} : memref<72x256xf32, #tpu.memory_space<vmem>>, vector<8x256xf32>,
    %c241_i32_58 = arith.constant 241 : i32
    %104 = tpu.dynamic_rotate %66 by %c241_i32_58 dim 1 : vector<8x256xf32>, i32 -> vector<8x256xf32>
    %c6_59 = arith.constant 6 : index
    %c0_60 = arith.constant 0 : index
    %105 = vector.load %arg6[%c6_59, %c0_60] : memref<9x256xf32, #tpu.memory_space<vmem>>, vector<1x256xf32>
    %106 = vector.shape_cast %105 : vector<1x256xf32> to vector<256xf32>
    %107 = vector.shape_cast %106 : vector<256xf32> to vector<1x256xf32>
    %108 = vector.broadcast %107 : vector<1x256xf32> to vector<8x256xf32>
    %109 = arith.mulf %104, %108 : vector<8x256xf32>
    %c48_61 = arith.constant 48 : index
    %c0_62 = arith.constant 0 : index
    %110 = vector.load %arg10[%c48_61, %c0_62] : memref<72x256xf32, #tpu.memory_space<vmem>>, vector<8x256xf32>
    tpu.vector_store %arg10[%c48_61, %c0_62], %109 {strides = array<i32>} : memref<72x256xf32, #tpu.memory_space<vmem>>, vector<8x256xf32>,
    %c240_i32_63 = arith.constant 240 : i32
    %111 = tpu.dynamic_rotate %66 by %c240_i32_63 dim 1 : vector<8x256xf32>, i32 -> vector<8x256xf32>
    %c7_64 = arith.constant 7 : index
    %c0_65 = arith.constant 0 : index
    %112 = vector.load %arg6[%c7_64, %c0_65] : memref<9x256xf32, #tpu.memory_space<vmem>>, vector<1x256xf32>
    %113 = vector.shape_cast %112 : vector<1x256xf32> to vector<256xf32>
    %114 = vector.shape_cast %113 : vector<256xf32> to vector<1x256xf32>
    %115 = vector.broadcast %114 : vector<1x256xf32> to vector<8x256xf32>
    %116 = arith.mulf %111, %115 : vector<8x256xf32>
    %c56_66 = arith.constant 56 : index
    %c0_67 = arith.constant 0 : index
    %117 = vector.load %arg10[%c56_66, %c0_67] : memref<72x256xf32, #tpu.memory_space<vmem>>, vector<8x256xf32>
    tpu.vector_store %arg10[%c56_66, %c0_67], %116 {strides = array<i32>} : memref<72x256xf32, #tpu.memory_space<vmem>>, vector<8x256xf32>,
    %c239_i32_68 = arith.constant 239 : i32
    %118 = tpu.dynamic_rotate %66 by %c239_i32_68 dim 1 : vector<8x256xf32>, i32 -> vector<8x256xf32>
    %c8_69 = arith.constant 8 : index
    %c0_70 = arith.constant 0 : index
    %119 = vector.load %arg6[%c8_69, %c0_70] : memref<9x256xf32, #tpu.memory_space<vmem>>, vector<1x256xf32>
    %120 = vector.shape_cast %119 : vector<1x256xf32> to vector<256xf32>
    %121 = vector.shape_cast %120 : vector<256xf32> to vector<1x256xf32>
    %122 = vector.broadcast %121 : vector<1x256xf32> to vector<8x256xf32>
    %123 = arith.mulf %118, %122 : vector<8x256xf32>
    %c64_71 = arith.constant 64 : index
    %c0_72 = arith.constant 0 : index
    %124 = vector.load %arg10[%c64_71, %c0_72] : memref<72x256xf32, #tpu.memory_space<vmem>>, vector<8x256xf32>
    tpu.vector_store %arg10[%c64_71, %c0_72], %123 {strides = array<i32>} : memref<72x256xf32, #tpu.memory_space<vmem>>, vector<8x256xf32>,
    %c0_73 = arith.constant 0 : index
    %c0_74 = arith.constant 0 : index
    %125 = vector.load %arg4[%c0_73, %c0_74] : memref<8x72xf32, #tpu.memory_space<vmem>>, vector<8x72xf32>
    %c0_75 = arith.constant 0 : index
    %c0_76 = arith.constant 0 : index
    %126 = vector.load %arg10[%c0_75, %c0_76] : memref<72x256xf32, #tpu.memory_space<vmem>>, vector<72x256xf32>
    %cst_77 = arith.constant dense<0.000000e+00> : vector<8x256xf32>
    %127 = tpu.matmul %125, %126, %cst_77 {dimension_numbers = #tpu.dot_dimension_numbers<[1], [0], [0], [1], [0, 0, 1, 1], [], []>} : vector<8x72xf32>, vector<72x256xf32>, vector<8x256xf32> -> vector<8x256xf32>
    %128 = vector.broadcast %67 : vector<8x1xf32> to vector<8x256xf32>
    %129 = arith.addf %127, %128 : vector<8x256xf32>
    %cst_78 = arith.constant 0.000000e+00 : f32
    %130 = vector.broadcast %cst_78 : f32 to vector<8x256xf32>
    %131 = arith.maximumf %129, %130 : vector<8x256xf32>
    %c0_79 = arith.constant 0 : index
    %c0_80 = arith.constant 0 : index
    %c0_81 = arith.constant 0 : index
    %132 = vector.load %arg7[%c0_79, %c0_80, %c0_81] : memref<1x1x256xf32, #tpu.memory_space<vmem>>, vector<1x1x256xf32>
    %133 = vector.shape_cast %132 : vector<1x1x256xf32> to vector<1x256xf32>
    %134 = vector.broadcast %133 : vector<1x256xf32> to vector<8x256xf32>
    %135 = arith.mulf %131, %134 : vector<8x256xf32>
    %c0_82 = arith.constant 0 : index
    %c0_83 = arith.constant 0 : index
    %c0_84 = arith.constant 0 : index
    %136 = vector.load %arg8[%c0_82, %c0_83, %c0_84] : memref<1x8x256xf32, #tpu.memory_space<vmem>>, vector<1x8x256xf32>
    %137 = vector.shape_cast %136 : vector<1x8x256xf32> to vector<8x256xf32>
    %138 = vector.shape_cast %135 : vector<8x256xf32> to vector<1x8x256xf32>
    tpu.vector_store %arg8[%c0_82, %c0_83, %c0_84], %138 {strides = array<i32>} : memref<1x8x256xf32, #tpu.memory_space<vmem>>, vector<1x8x256xf32>,
    return
  }
  func.func @transform_0(%arg0: i32) -> (i32, i32, i32) {
    %c0_i32 = arith.constant 0 : i32
    %c0_i32_0 = arith.constant 0 : i32
    %c0_i32_1 = arith.constant 0 : i32
    return %arg0, %c0_i32, %c0_i32_0 : i32, i32, i32
  }
  func.func @transform_1(%arg0: i32) -> (i32, i32) {
    %c0_i32 = arith.constant 0 : i32
    %c0_i32_0 = arith.constant 0 : i32
    %c0_i32_1 = arith.constant 0 : i32
    return %c0_i32, %c0_i32_0 : i32, i32
  }
  func.func @transform_2(%arg0: i32) -> (i32, i32) {
    %c0_i32 = arith.constant 0 : i32
    %c0_i32_0 = arith.constant 0 : i32
    %c0_i32_1 = arith.constant 0 : i32
    return %c0_i32, %c0_i32_0 : i32, i32
  }
  func.func @transform_3(%arg0: i32) -> (i32, i32) {
    %c0_i32 = arith.constant 0 : i32
    %c0_i32_0 = arith.constant 0 : i32
    %c0_i32_1 = arith.constant 0 : i32
    return %c0_i32, %c0_i32_0 : i32, i32
  }
  func.func @transform_4(%arg0: i32) -> (i32, i32) {
    %c0_i32 = arith.constant 0 : i32
    %c0_i32_0 = arith.constant 0 : i32
    %c0_i32_1 = arith.constant 0 : i32
    return %c0_i32, %c0_i32_0 : i32, i32
  }
  func.func @transform_5(%arg0: i32) -> (i32, i32) {
    %c0_i32 = arith.constant 0 : i32
    %c0_i32_0 = arith.constant 0 : i32
    %c0_i32_1 = arith.constant 0 : i32
    return %c0_i32, %c0_i32_0 : i32, i32
  }
  func.func @transform_6(%arg0: i32) -> (i32, i32, i32) {
    %c0_i32 = arith.constant 0 : i32
    %c0_i32_0 = arith.constant 0 : i32
    %c0_i32_1 = arith.constant 0 : i32
    return %arg0, %c0_i32, %c0_i32_0 : i32, i32, i32
  }
  func.func @transform_7(%arg0: i32) -> (i32, i32, i32) {
    %c0_i32 = arith.constant 0 : i32
    %c0_i32_0 = arith.constant 0 : i32
    %c0_i32_1 = arith.constant 0 : i32
    return %arg0, %c0_i32, %c0_i32_0 : i32, i32, i32
  }
}

</mosaic_0001>

<bundles_post_ra>
// kernel: tpu_custom_call.1
= control target key start
LH: loop header
LB: loop body
LE: loop exit
PB: predicated region body
PF: predicated region fallthrough
CT: control target
= control target key end

     0   :  { %s1661_s0 = inlined_call_operand.hbm [shape: f32[4,8,256], index: 0, kind: input, shape index: {}]   ;;  %s1662_s1 = inlined_call_operand.vmem [shape: f32[8,72], index: 1, kind: input, shape index: {}]   ;;  %s1663_s2 = inlined_call_operand.vmem [shape: f32[8,1], index: 2, kind: input, shape index: {}]   ;;  %s1664_s3 = inlined_call_operand.vmem [shape: f32[8,72], index: 3, kind: input, shape index: {}]   ;;  %s1665_s4 = inlined_call_operand.vmem [shape: f32[8,1], index: 4, kind: input, shape index: {}]   ;;  %s1666_s5 = inlined_call_operand.hbm [shape: f32[9,256], index: 5, kind: input, shape index: {}]   ;;  %s1667_s6 = inlined_call_operand.vmem [shape: f32[4,1,256], index: 6, kind: input, shape index: {}]   ;;  %s1668_s7 = inlined_call_operand.hbm [shape: f32[4,8,256], index: 7, kind: output, shape index: {}]  }
   0x1   :  { %1673 = sst [smem:[#allocation14_spill]] %s1666_s5 }
   0x2   :  { %12 = vsyncpa [#allocation5], 0 }
   0x3   :  { %14 = vsyncpa [#allocation5 + $0x1], 0 }
   0x4   :  { %15 = vsyncpa [#allocation8], 0 }
   0x5   :  { %16 = vsyncpa [#allocation6], 0 }
   0x6   :  { %18 = vsyncpa [#allocation6 + $0x1], 0  ;;  %s1298_s24 = smov 0   ;;  %s1300_s25 = smov 0  }
   0x7   :  { %s1302_s26 = smov 0   ;;  %s1304_s27 = smov 0  }
   0x8 LB: > { %s1319_s28 = sadd.s32 4294967295, %s1241_s27   ;;  %s1028_s29 = sadd.s32 4294967294, %s1241_s27   ;;  %s1241_s27 = sphi %s1304_s27, %s1693_s27   ;;  %s1237_s26 = sphi %s1302_s26, %s1692_s26   ;;  %s1233_s25 = sphi %s1300_s25, %s1691_s25   ;;  %s1229_s24 = sphi %s1298_s24, %s1690_s24  }
   0x9   : > { %p44_p0 = scmp.ne.s32.totalorder %s1233_s25, %s1229_s24  ;;  %p1669_p1 = scmp.eq.s32.totalorder %s1319_s28, 0 }
   0xa   : > { %p205_p3 = scmp.eq.s32.totalorder %s1028_s29, 3  ;;  %p1029_p5 = scmp.ge.s32.totalorder %s1241_s27, 1 }
   0xb   : > { %p1328_p4 = por %p1669_p1, %p44_p0  ;;  %p212_p7 = scmp.lt.s32.totalorder %s1241_s27, 5 }
   0xc   : > { %p1333_p6 = por %p205_p3, %p44_p0  ;;  %s1243_s10 = smov [#allocation7]  }
   0xd   : > { %s1674_s30 = scalar_select %p1328_p4, 1, 0 }
   0xe   : > { %s1675_s8 = scalar_select %p1333_p6, 1, 0 }
   0xf   : > { %p1338_p8 = pnand %p1029_p5, %p212_p7  ;;  %s236_s11 = sshll.u32 %s1243_s10, 4  ;;  %s237_s11 = int_to_ptr.vmem [resolvable:$true] %s236_s11 }
  0x10   : > { %s1351_s13 = sadd.s32 1, %s1241_s27   ;;  %s31_s14 = sadd.s32 1, %s1237_s26 }
  0x11   : > { %s1676_s9 = scalar_select %p1338_p8, 1, 0 }
  0x12   : > { %p1057_p9 = pneg %p1338_p8  ;;  %s28_s15 = ssub.s32 %s1241_s27, %s1351_s13 }
  0x13   : > { %s1130_s16 = scalar_lea.vmem %s237_s11, 512  ;;  %p1138_p3 = scmp.lt.s32.totalorder %s237_s11, %s237_s11 }
  0x14   : > { %p1346_p10 = pnand %p1057_p9, %p1669_p1  ;;  %p1131_p12 = scmp.ne.s32.totalorder %s237_s11, %s1130_s16 }
  0x15   : > { %p1139_p5 = scmp.lt.s32.totalorder %s1130_s16, %s1130_s16 }
  0x16   : > { %p1121_p11 = pneg %p1346_p10 }
  0x17   : > { %p1140_p7 = por %p1139_p5, %p1138_p3 }
  0x18   : > { %p1133_p13 = pnand %p1131_p12, %p1121_p11 }
  0x1a   : > { %p1134_p0 = pneg %p1133_p13 }
  0x1c   : > { %p1141_p2 = pnand %p1140_p7, %p1134_p0 }
  0x1e   : > { %1144 = shalt.err (!%p1141_p2)
}
  0x1f   : > { %s1244_s17 = smov 256   ;;  %s1245_s18 = smov 16  }
  0x20   : > { %s1678_s5 = sld [smem:[#allocation14_spill]]  ;;  %p29_p9 = scmp.eq.s32.totalorder %s28_s15, 0 }
  0x21   : > { %p38_p11 = scmp.ne.s32.totalorder %s1237_s26, %s1233_s25  ;;  %p39_p12 = scmp.eq.s32.totalorder %s1241_s27, 0 }
  0x22   : > { %p1070_p2 = scmp.lt.s32.totalorder %s1241_s27, 4  ;;  %p1680_p0 = scmp.eq.s32.totalorder %s1319_s28, 3 }
  0x23   : > { %s1368_s21 = scalar_select %p29_p9, %s1237_s26, %s31_s14  }
  0x24   : > { %p40_p13 = por %p39_p12, %p38_p11  ;;  %p1372_p3 = por %p1680_p0, %p38_p11 }
  0x25   : > { %1679 = sst [smem:[#allocation13_spill]] %s1368_s21  ;;  %s250_s23 = sand.u32 1, %s1237_s26  }
  0x26   : > { %1060 = dma.hbm_to_vmem [thread:$0]  (!%p1346_p10), %s1678_s5, 512, %s237_s11, [#allocation8], %s1244_s17, %s1244_s17, %s1245_s18  }
  0x27   : > { %s1681_s22 = scalar_select %p1372_p3, 1, 0 }
  0x28   : > { %s1047_s29 = sshll.u32 %s1241_s27, 8  ;;  %s1032_s10 = sshll.u32 %s250_s23, 4 }
  0x29   : > { %s1381_s19 = scalar_lea.hbm %s1661_s0, %s1047_s29  ;;  %s254_s11 = scalar_lea.vmem [#allocation4], %s1032_s10 }
  0x2a   : > { %s262_s14 = sshll.u32 %s254_s11, 4  ;;  %p1383_p10 = pnand %p1070_p2, %p40_p13  ;;  %s263_s14 = int_to_ptr.vmem [resolvable:$true] %s262_s14 }
  0x2b   : > { %s251_s17 = scalar_lea.sflag [#allocation5], %s250_s23  ;;  %s1145_s18 = scalar_lea.hbm %s1381_s19, 256 }
  0x2c   : > { %p1146_p5 = scmp.ne.s32.totalorder %s1381_s19, %s1145_s18  ;;  %p1147_p7 = pneg %p1383_p10 }
  0x2d   : > { %s1150_s12 = scalar_lea.hbm %s1661_s0, 1024  ;;  %p1151_p12 = scmp.lt.s32.totalorder %s1381_s19, %s1661_s0 }
  0x2e   : > { %p1148_p9 = pnand %p1147_p7, %p1146_p5  ;;  %p1152_p2 = scmp.lt.s32.totalorder %s1150_s12, %s1145_s18 }
  0x30   : > { %p1149_p11 = pneg %p1148_p9  ;;  %p1153_p13 = por %p1152_p2, %p1151_p12 }
  0x32   : > { %p1154_p0 = pnand %p1153_p13, %p1149_p11 }
  0x34   : > { %1157 = shalt.err (!%p1154_p0)
}
  0x35   : > { %s1158_s11 = scalar_lea.vmem %s263_s14, 256  ;;  %s1246_s23 = smov [#allocation4]  }
  0x36   : > { %p1159_p1 = scmp.ne.s32.totalorder %s263_s14, %s1158_s11  ;;  %s1163_s5 = sshll.u32 %s1246_s23, 4  ;;  %s1164_s5 = int_to_ptr.vmem [resolvable:$false] %s1163_s5 }
  0x37   : > { %s1165_s21 = scalar_lea.vmem %s1164_s5, 512  ;;  %p1166_p5 = scmp.lt.s32.totalorder %s263_s14, %s1164_s5 }
  0x38   : > { %p1161_p6 = pnand %p1159_p1, %p1147_p7  ;;  %p1167_p9 = scmp.lt.s32.totalorder %s1165_s21, %s1158_s11 }
  0x3a   : > { %p1162_p3 = pneg %p1161_p6  ;;  %p1168_p4 = por %p1167_p9, %p1166_p5 }
  0x3c   : > { %p1169_p8 = pnand %p1168_p4, %p1162_p3 }
  0x3e   : > { %1172 = shalt.err (!%p1169_p8)
}
  0x3f   : > { %1064 = dma.hbm_to_vmem [thread:$0]  (!%p1383_p10), %s1381_s19, 256, %s263_s14, %s251_s17  }
  0x40   : > { %p1683_p11 = scmp.ne.s32.totalorder %s1676_s9, 0 }
  0x41   : > { %s1404_s18 = sand.u32 (!%p1683_p11), 1, %s1233_s25   ;;  %p1684_p1 = scmp.ne.s32.totalorder (!%p1683_p11), %s1674_s30, 0 }
  0x42   : > { %278 = sbr.rel (%p1683_p11) target bundleno = 787 (0x313), region = 48  ;;  %s1036_s20 = sshll.u32 (!%p1683_p11), %s1404_s18, 4 }
  0x43   : > { %s281_s5 = scalar_lea.sflag (!%p1683_p11), [#allocation5], %s1404_s18  ;;  %s284_s21 = scalar_lea.vmem (!%p1683_p11), [#allocation4], %s1036_s20 }
  0x47   : > { %1216 = dma.done.wait (%p1684_p1), %s281_s5, 256  }
  0x48   : > { %1218 = vsyncadd (%p1684_p1), %s281_s5, 4294967040  ;;  %p1685_p4 = scmp.eq.s32.totalorder %s1319_s28, 0 }
  0x4a   : > { %1220 = dma.done.wait (%p1685_p4), [#allocation8], 512   ;;  %p1686_p6 = pmov %p1685_p4 }
  0x4b   : > { %v1418_v0 = vld [vmem:[%s284_s21] sm:$0xff]  ;;  %s1247_s9 = smov 112   ;;  %s1248_s19 = smov 111   ;;  %v1424_v1 = vld [vmem:[%s284_s21 + $0x8] sm:$0xff]  ;;  %v1252_v2 = vmov 0.0   ;;  %v1254_v3 = vmov 0   ;;  %v334_v5 = vlaneseq }
  0x4c   : > { %1222 = vsyncadd (%p1686_p6), [#allocation8], 4294966784  ;;  %477 = vrot.lane.b32.xlu1 %v1418_v0, %s1247_s9  ;;  %501 = vrot.lane.b32.xlu0 %v1418_v0, %s1248_s19  ;;  %s1249_s30 = smov 113   ;;  %s1250_s14 = smov 127   ;;  %v329_v4 = vld [vmem:[%s1663_s2] sm:$0xff]  ;;  %vm549_vm8 = vcmask 588800  }
  0x4d   : > { %s1251_s15 = smov 1   ;;  %617 = vmatprep.mubr.f32.mxu0 %v1252_v2  ;;  %896 = vmatprep.mubr.f32.mxu1 %v1252_v2  ;;  %s1253_s17 = smov 15   ;;  %v342_v6 = vshrl.u32 %v334_v5, 7  ;;  %v1457_v7 = vand.u32 127, %v334_v5 }
  0x4e   : > { %1118 = vset.pattern.permute.xlu0 %v1254_v3  ;;  %s1255_s29 = smov 16   ;;  %s1256_s12 = smov 17   ;;  %v509_v10 = vld [vmem:[#allocation7 + $0x10] ss:$8 sm:$0x3] }
  0x4f   : > { %v1459_v8 = vsub.s32 0, %v342_v6  ;;  %v1461_v9 = vsub.s32 1, %v342_v6  ;;  %v485_v13 = vld [vmem:[#allocation7 + $0x7] ss:$8 sm:$0x3]  ;;  %vm481_vm0 = vcmp.lt.s32.totalorder %v1457_v7, 112 }
  0x50   : > { %479 = vrot.lane.b32.xlu1 %v1424_v1, %s1247_s9  ;;  %503 = vrot.lane.b32.xlu0 %v1424_v1, %s1248_s19  ;;  %vm505_vm1 = vcmp.lt.s32.totalorder %v1457_v7, 111  ;;  %v461_v15 = vld [vmem:[#allocation7 + $0x6] ss:$8 sm:$0x3]  ;;  %vm457_vm2 = vcmp.lt.s32.totalorder %v1457_v7, 113  ;;  %vm433_vm3 = vcmp.lt.s32.totalorder %v1457_v7, 127 }
  0x51   : > { %v518_v14 = vrot.slane %v509_v10, %v1461_v9  ;;  %v514_v16 = vrot.slane %v509_v10, %v1459_v8  ;;  %v490_v17 = vrot.slane %v485_v13, %v1459_v8  ;;  %v494_v18 = vrot.slane %v485_v13, %v1461_v9  ;;  %v437_v29 = vld [vmem:[#allocation7 + $0x5] ss:$8 sm:$0x3]  ;;  %v411_v40 = vld [vmem:[#allocation7 + $0x3] ss:$8 sm:$0x3] }
  0x52   : > { %v466_v24 = vrot.slane %v461_v15, %v1459_v8  ;;  %v470_v27 = vrot.slane %v461_v15, %v1461_v9  ;;  %v442_v38 = vrot.slane %v437_v29, %v1459_v8  ;;  %v446_v39 = vrot.slane %v437_v29, %v1461_v9  ;;  %v387_v49 = vld [vmem:[#allocation7 + $0x2] ss:$8 sm:$0x3]  ;;  %v363_v58 = vld [vmem:[#allocation7 + $0x1] ss:$8 sm:$0x3] }
  0x53   : > { %vm407_vm4 = vcmp.lt.s32.totalorder %v1457_v7, 1  ;;  %v416_v47 = vrot.slane %v411_v40, %v1459_v8  ;;  %v420_v48 = vrot.slane %v411_v40, %v1461_v9  ;;  %vm383_vm5 = vcmp.lt.s32.totalorder %v1457_v7, 15  ;;  %v626_v29 = vld [vmem:[%s1665_s4] sm:$0xff]  ;;  %p323_p8 = scmp.lt.s32.totalorder %s1319_s28, 3  ;;  %s322_s16 = scalar_lea.vmem [#allocation9], %s1036_s20 }
  0x54   : > { %455 = vrot.lane.b32.xlu1 %v1424_v1, %s1249_s30  ;;  %453 = vrot.lane.b32.xlu0 %v1418_v0, %s1249_s30  ;;  %v392_v56 = vrot.slane %v387_v49, %v1459_v8  ;;  %v396_v57 = vrot.slane %v387_v49, %v1461_v9  ;;  %vm359_vm6 = vcmp.lt.s32.totalorder %v1457_v7, 16  ;;  %v368_v2 = vrot.slane %v363_v58, %v1459_v8  ;;  %s936_s10 = sshll.u32 %s322_s16, 4  ;;  %s922_s21 = scalar_lea.sflag [#allocation6], %s1404_s18  ;;  %s937_s10 = int_to_ptr.vmem [resolvable:$true] %s936_s10 }
  0x55   : > { %v372_v3 = vrot.slane %v363_v58, %v1461_v9  ;;  %vm336_vm7 = vcmp.lt.s32.totalorder %v1457_v7, 17  ;;  %p1687_p10 = scmp.ne.s32.totalorder %s1681_s22, 0 }
  0x58   : > { %431 = vrot.lane.b32.xlu1 %v1424_v1, %s1250_s14  ;;  %429 = vrot.lane.b32.xlu0 %v1418_v0, %s1250_s14 }
  0x5c   : > { %405 = vrot.lane.b32.xlu1 %v1424_v1, %s1251_s15  ;;  %403 = vrot.lane.b32.xlu0 %v1418_v0, %s1251_s15 }
  0x60   : > { %381 = vrot.lane.b32.xlu1 %v1424_v1, %s1253_s17  ;;  %379 = vrot.lane.b32.xlu0 %v1418_v0, %s1253_s17 }
  0x64   : > { %357 = vrot.lane.b32.xlu1 %v1424_v1, %s1255_s29  ;;  %355 = vrot.lane.b32.xlu0 %v1418_v0, %s1255_s29 }
  0x68   : > { %332 = vrot.lane.b32.xlu1 %v1424_v1, %s1256_s12  ;;  %330 = vrot.lane.b32.xlu0 %v1418_v0, %s1256_s12 }
  0x6c   : > { %546 = vperm.xlu0 %1118, %v329_v4  }
  0xbe   : > { %v478_v11 = vpop.permute.xlu1 %477  ;;  %v502_v12 = vpop.permute.xlu0 %501 }
  0xc2   : > { %v480_v19 = vpop.permute.xlu1 %479  ;;  %v504_v20 = vpop.permute.xlu0 %503 }
  0xc3   : > { %v483_v21 = vsel %vm481_vm0, %v480_v19, %v478_v11  ;;  %v506_v22 = vsel %vm505_vm1, %v502_v12, %v504_v20  ;;  %v507_v23 = vsel %vm505_vm1, %v504_v20, %v502_v12  ;;  %v482_v25 = vsel %vm481_vm0, %v478_v11, %v480_v19 }
  0xc4   : > { %v522_v26 = vmul.f32 %v518_v14, %v507_v23  ;;  %v521_v28 = vmul.f32 %v514_v16, %v506_v22  ;;  %v498_v30 = vmul.f32 %v494_v18, %v483_v21  ;;  %v497_v33 = vmul.f32 %v490_v17, %v482_v25  ;;  %v525_v21 = vld [vmem:[%s1662_s1] sm:$0xff] }
  0xc6   : > { %v456_v31 = vpop.permute.xlu1 %455  ;;  %567 = vmatprep.subr.mxu0 %v522_v26  ;;  %v454_v32 = vpop.permute.xlu0 %453 }
  0xc7   : > { %v458_v34 = vsel %vm457_vm2, %v454_v32, %v456_v31  ;;  %v459_v35 = vsel %vm457_vm2, %v456_v31, %v454_v32  ;;  %568 = vmatpush1.msra.mxu0 %v521_v28 }
  0xc8   : > { %v473_v36 = vmul.f32 %v466_v24, %v458_v34  ;;  %v474_v37 = vmul.f32 %v470_v27, %v459_v35  ;;  %569 = vmatprep.subr.mxu0 %v498_v30  ;;  %v789_v30 = vld [vmem:[#allocation7 + $0x10] ss:$8 sm:$0x3]  ;;  %v767_v35 = vld [vmem:[#allocation7 + $0x7] ss:$8 sm:$0x3] }
  0xc9   : > { %570 = vmatpush1.msra.mxu0 %v497_v33  ;;  %v798_v33 = vrot.slane %v789_v30, %v1461_v9  ;;  %v794_v34 = vrot.slane %v789_v30, %v1459_v8 }
  0xca   : > { %v432_v41 = vpop.permute.xlu1 %431  ;;  %571 = vmatprep.subr.mxu0 %v474_v37  ;;  %v430_v42 = vpop.permute.xlu0 %429 }
  0xcb   : > { %v434_v43 = vsel %vm433_vm3, %v430_v42, %v432_v41  ;;  %v435_v44 = vsel %vm433_vm3, %v432_v41, %v430_v42  ;;  %572 = vmatpush1.msra.mxu0 %v473_v36  ;;  %v772_v41 = vrot.slane %v767_v35, %v1459_v8  ;;  %v776_v42 = vrot.slane %v767_v35, %v1461_v9 }
  0xcc   : > { %v449_v45 = vmul.f32 %v442_v38, %v434_v43  ;;  %v450_v46 = vmul.f32 %v446_v39, %v435_v44  ;;  %v745_v44 = vld [vmem:[#allocation7 + $0x6] ss:$8 sm:$0x3] }
  0xce   : > { %v406_v50 = vpop.permute.xlu1 %405  ;;  %573 = vmatprep.subr.mxu0 %v450_v46  ;;  %v404_v51 = vpop.permute.xlu0 %403 }
  0xcf   : > { %v408_v52 = vsel %vm407_vm4, %v404_v51, %v406_v50  ;;  %v409_v53 = vsel %vm407_vm4, %v406_v50, %v404_v51  ;;  %574 = vmatpush1.msra.mxu0 %v449_v45  ;;  %v750_v51 = vrot.slane %v745_v44, %v1459_v8 }
  0xd0   : > { %v423_v54 = vmul.f32 %v416_v47, %v409_v53  ;;  %v424_v55 = vmul.f32 %v420_v48, %v408_v52  ;;  %575 = vmatprep.subr.mxu0 %v1424_v1  ;;  %v754_v52 = vrot.slane %v745_v44, %v1461_v9  ;;  %v723_v53 = vld [vmem:[#allocation7 + $0x5] ss:$8 sm:$0x3] }
  0xd1   : > { %576 = vmatpush1.msra.mxu0 %v1418_v0  ;;  %v339_v0 = vld [vmem:[#allocation7] ss:$8 sm:$0x3] }
  0xd2   : > { %v382_v59 = vpop.permute.xlu1 %381  ;;  %577 = vmatprep.subr.mxu0 %v424_v55  ;;  %v380_v60 = vpop.permute.xlu0 %379  ;;  %v344_v13 = vrot.slane %v339_v0, %v1459_v8  ;;  %v348_v14 = vrot.slane %v339_v0, %v1461_v9 }
  0xd3   : > { %v384_v61 = vsel %vm383_vm5, %v380_v60, %v382_v59  ;;  %v385_v62 = vsel %vm383_vm5, %v382_v59, %v380_v60  ;;  %578 = vmatpush1.msra.mxu0 %v423_v54  ;;  %v728_v60 = vrot.slane %v723_v53, %v1459_v8 }
  0xd4   : > { %v399_v63 = vmul.f32 %v392_v56, %v385_v62  ;;  %v400_v1 = vmul.f32 %v396_v57, %v384_v61  ;;  %v732_v61 = vrot.slane %v723_v53, %v1461_v9  ;;  %v699_v62 = vld [vmem:[#allocation7 + $0x3] ss:$8 sm:$0x3] }
  0xd6   : > { %v358_v4 = vpop.permute.xlu1 %357  ;;  %579 = vmatprep.subr.mxu0 %v400_v1  ;;  %v356_v5 = vpop.permute.xlu0 %355 }
  0xd7   : > { %v360_v6 = vsel %vm359_vm6, %v356_v5, %v358_v4  ;;  %v361_v10 = vsel %vm359_vm6, %v358_v4, %v356_v5  ;;  %580 = vmatpush1.msra.mxu0 %v399_v63  ;;  %v704_v4 = vrot.slane %v699_v62, %v1459_v8  ;;  %v708_v5 = vrot.slane %v699_v62, %v1461_v9 }
  0xd8   : > { %v375_v11 = vmul.f32 %v368_v2, %v361_v10  ;;  %v376_v12 = vmul.f32 %v372_v3, %v360_v6  ;;  %v677_v6 = vld [vmem:[#allocation7 + $0x2] ss:$8 sm:$0x3] }
  0xda   : > { %v333_v15 = vpop.permute.xlu1 %332  ;;  %581 = vmatprep.subr.mxu0 %v376_v12  ;;  %v331_v16 = vpop.permute.xlu0 %330 }
  0xdb   : > { %v337_v17 = vsel %vm336_vm7, %v331_v16, %v333_v15  ;;  %v338_v18 = vsel %vm336_vm7, %v333_v15, %v331_v16  ;;  %582 = vmatpush1.msra.mxu0 %v375_v11  ;;  %v682_v16 = vrot.slane %v677_v6, %v1459_v8 }
  0xdc   : > { %v351_v19 = vmul.f32 %v344_v13, %v338_v18  ;;  %v352_v20 = vmul.f32 %v348_v14, %v337_v17  ;;  %v686_v17 = vrot.slane %v677_v6, %v1461_v9  ;;  %v655_v18 = vld [vmem:[#allocation7 + $0x1] ss:$8 sm:$0x3] }
  0xde   : > { %583 = vmatprep.subr.mxu0 %v352_v20 }
  0xdf   : > { %584 = vmatpush1.msra.mxu0 %v351_v19 }
  0xe0   : > { %1040 = vmatmul.mubr.msk.f32.vlgmr.msra.gmra.mxu0 %vm549_vm8, %v525_v21 }
  0xe7   : > { %v547_v22 = vpop.permute.xlu0 %546 }
 0x1a0   : > { %v619_v23 = vpop.f32.mrf.mxu0 }
 0x1a1   : > { %v620_v24 = vadd.f32 %v619_v23, %v547_v22 }
 0x1a2   : > { %v621_v25 = vpop.f32.mrf.mxu0 }
 0x1a3   : > { %v1525_v26 = vmax.f32 %v620_v24, 0.0  ;;  %v622_v27 = vadd.f32 %v621_v25, %v547_v22  ;;  %v660_v25 = vrot.slane %v655_v18, %v1459_v8 }
 0x1a5   : > { %761 = vrot.lane.b32.xlu0 %v1525_v26, %s1247_s9  ;;  %783 = vrot.lane.b32.xlu1 %v1525_v26, %s1248_s19  ;;  %v1531_v28 = vmax.f32 %v622_v27, 0.0  ;;  %v664_v27 = vrot.slane %v655_v18, %v1461_v9 }
 0x1a9   : > { %739 = vrot.lane.b32.xlu0 %v1525_v26, %s1249_s30  ;;  %785 = vrot.lane.b32.xlu1 %v1531_v28, %s1248_s19 }
 0x1ad   : > { %717 = vrot.lane.b32.xlu0 %v1525_v26, %s1250_s14  ;;  %763 = vrot.lane.b32.xlu1 %v1531_v28, %s1247_s9  ;;  %s1173_s9 = scalar_lea.vmem %s937_s10, 256 }
 0x1ae   : > { %p1174_p3 = scmp.ne.s32.totalorder %s937_s10, %s1173_s9 }
 0x1b0   : > { %p1175_p7 = pnand %p1174_p3, %p1687_p10 }
 0x1b1   : > { %693 = vrot.lane.b32.xlu0 %v1525_v26, %s1251_s15  ;;  %741 = vrot.lane.b32.xlu1 %v1531_v28, %s1249_s30  ;;  %s324_s30 = scalar_select %p323_p8, %s1319_s28, 3 }
 0x1b2   : > { %p1176_p12 = pneg %p1175_p7 }
 0x1b5   : > { %671 = vrot.lane.b32.xlu0 %v1525_v26, %s1253_s17  ;;  %719 = vrot.lane.b32.xlu1 %v1531_v28, %s1250_s14  ;;  %s1039_s14 = sshll.u32 %s324_s30, 1 }
 0x1b9   : > { %649 = vrot.lane.b32.xlu0 %v1525_v26, %s1255_s29  ;;  %695 = vrot.lane.b32.xlu1 %v1531_v28, %s1251_s15 }
 0x1bd   : > { %627 = vrot.lane.b32.xlu0 %v1525_v26, %s1256_s12  ;;  %673 = vrot.lane.b32.xlu1 %v1531_v28, %s1253_s17 }
 0x1c1   : > { %826 = vperm.xlu0 %1118, %v626_v29   ;;  %651 = vrot.lane.b32.xlu1 %v1531_v28, %s1255_s29  ;;  %s326_s29 = scalar_lea.vmem %s1667_s6, %s1039_s14 }
 0x1c2   : > { %v905_v7 = vld [vmem:[%s326_s29] sm:$0x3] }
 0x1c5   : > { %629 = vrot.lane.b32.xlu1 %v1531_v28, %s1256_s12  ;;  %s1048_s12 = sshll.u32 %s1319_s28, 8  ;;  %s1257_s28 = smov [#allocation9]  }
 0x1c6   : > { %s934_s5 = scalar_lea.hbm %s1668_s7, %s1048_s12  ;;  %s1177_s19 = sshll.u32 %s1257_s28, 4  ;;  %s1178_s19 = int_to_ptr.vmem [resolvable:$false] %s1177_s19 }
 0x1c7   : > { %s1179_s20 = scalar_lea.vmem %s1178_s19, 512  ;;  %p1180_p2 = scmp.lt.s32.totalorder %s937_s10, %s1178_s19 }
 0x1c8   : > { %p1181_p13 = scmp.lt.s32.totalorder %s1179_s20, %s1173_s9 }
 0x1ca   : > { %p1182_p0 = por %p1181_p13, %p1180_p2 }
 0x1cc   : > { %p1183_p5 = pnand %p1182_p0, %p1176_p12 }
 0x217   : > { %v762_v31 = vpop.permute.xlu0 %761  ;;  %v784_v32 = vpop.permute.xlu1 %783 }
 0x21b   : > { %v740_v36 = vpop.permute.xlu0 %739  ;;  %v786_v37 = vpop.permute.xlu1 %785 }
 0x21c   : > { %v787_v38 = vsel %vm505_vm1, %v784_v32, %v786_v37  ;;  %v788_v39 = vsel %vm505_vm1, %v786_v37, %v784_v32 }
 0x21d   : > { %v802_v40 = vmul.f32 %v798_v33, %v788_v39  ;;  %v801_v43 = vmul.f32 %v794_v34, %v787_v38 }
 0x21f   : > { %v718_v45 = vpop.permute.xlu0 %717  ;;  %846 = vmatprep.subr.mxu1 %v802_v40  ;;  %v764_v46 = vpop.permute.xlu1 %763 }
 0x220   : > { %v765_v47 = vsel %vm481_vm0, %v762_v31, %v764_v46  ;;  %v766_v48 = vsel %vm481_vm0, %v764_v46, %v762_v31  ;;  %847 = vmatpush1.msra.mxu1 %v801_v43 }
 0x221   : > { %v779_v49 = vmul.f32 %v772_v41, %v765_v47  ;;  %v780_v50 = vmul.f32 %v776_v42, %v766_v48  ;;  %v805_v41 = vld [vmem:[%s1664_s3] sm:$0xff] }
 0x223   : > { %848 = vmatprep.subr.mxu1 %v780_v50  ;;  %v742_v54 = vpop.permute.xlu1 %741  ;;  %v694_v57 = vpop.permute.xlu0 %693 }
 0x224   : > { %v743_v55 = vsel %vm457_vm2, %v740_v36, %v742_v54  ;;  %v744_v56 = vsel %vm457_vm2, %v742_v54, %v740_v36  ;;  %849 = vmatpush1.msra.mxu1 %v779_v49  ;;  %v914_v49 = vrot.slane %v905_v7, %v1461_v9 }
 0x225   : > { %v757_v58 = vmul.f32 %v750_v51, %v743_v55  ;;  %v758_v59 = vmul.f32 %v754_v52, %v744_v56 }
 0x227   : > { %850 = vmatprep.subr.mxu1 %v758_v59  ;;  %v720_v63 = vpop.permute.xlu1 %719  ;;  %v672_v10 = vpop.permute.xlu0 %671 }
 0x228   : > { %v721_v1 = vsel %vm433_vm3, %v718_v45, %v720_v63  ;;  %v722_v2 = vsel %vm433_vm3, %v720_v63, %v718_v45  ;;  %851 = vmatpush1.msra.mxu1 %v757_v58  ;;  %v910_v45 = vrot.slane %v905_v7, %v1459_v8 }
 0x229   : > { %v735_v3 = vmul.f32 %v728_v60, %v721_v1  ;;  %v736_v0 = vmul.f32 %v732_v61, %v722_v2 }
 0x22b   : > { %852 = vmatprep.subr.mxu1 %v736_v0  ;;  %v696_v11 = vpop.permute.xlu1 %695  ;;  %v650_v22 = vpop.permute.xlu0 %649 }
 0x22c   : > { %v697_v12 = vsel %vm407_vm4, %v694_v57, %v696_v11  ;;  %v698_v13 = vsel %vm407_vm4, %v696_v11, %v694_v57  ;;  %853 = vmatpush1.msra.mxu1 %v735_v3 }
 0x22d   : > { %v711_v14 = vmul.f32 %v704_v4, %v698_v13  ;;  %v712_v15 = vmul.f32 %v708_v5, %v697_v12  ;;  %854 = vmatprep.subr.mxu1 %v1531_v28  ;;  %v633_v28 = vld [vmem:[#allocation7] ss:$8 sm:$0x3] }
 0x22e   : > { %855 = vmatpush1.msra.mxu1 %v1525_v26  ;;  %v638_v33 = vrot.slane %v633_v28, %v1459_v8  ;;  %v642_v34 = vrot.slane %v633_v28, %v1461_v9 }
 0x22f   : > { %856 = vmatprep.subr.mxu1 %v712_v15  ;;  %v674_v19 = vpop.permute.xlu1 %673  ;;  %v628_v35 = vpop.permute.xlu0 %627 }
 0x230   : > { %v675_v20 = vsel %vm383_vm5, %v672_v10, %v674_v19  ;;  %v676_v21 = vsel %vm383_vm5, %v674_v19, %v672_v10  ;;  %857 = vmatpush1.msra.mxu1 %v711_v14 }
 0x231   : > { %v689_v23 = vmul.f32 %v682_v16, %v676_v21  ;;  %v690_v24 = vmul.f32 %v686_v17, %v675_v20 }
 0x233   : > { %858 = vmatprep.subr.mxu1 %v690_v24  ;;  %v652_v26 = vpop.permute.xlu1 %651 }
 0x234   : > { %v653_v29 = vsel %vm359_vm6, %v650_v22, %v652_v26  ;;  %v654_v30 = vsel %vm359_vm6, %v652_v26, %v650_v22  ;;  %859 = vmatpush1.msra.mxu1 %v689_v23 }
 0x235   : > { %v667_v31 = vmul.f32 %v660_v25, %v654_v30  ;;  %v668_v32 = vmul.f32 %v664_v27, %v653_v29 }
 0x237   : > { %860 = vmatprep.subr.mxu1 %v668_v32  ;;  %v630_v36 = vpop.permute.xlu1 %629 }
 0x238   : > { %v631_v37 = vsel %vm336_vm7, %v628_v35, %v630_v36  ;;  %v632_v38 = vsel %vm336_vm7, %v630_v36, %v628_v35  ;;  %861 = vmatpush1.msra.mxu1 %v667_v31 }
 0x239   : > { %v645_v39 = vmul.f32 %v638_v33, %v632_v38  ;;  %v646_v40 = vmul.f32 %v642_v34, %v631_v37 }
 0x23b   : > { %862 = vmatprep.subr.mxu1 %v646_v40 }
 0x23c   : > { %863 = vmatpush1.msra.mxu1 %v645_v39  ;;  %v827_v42 = vpop.permute.xlu0 %826 }
 0x23d   : > { %1041 = vmatmul.mubr.msk.f32.vlgmr.msra.gmra.mxu1 %vm549_vm8, %v805_v41 }
 0x2fd   : > { %v898_v43 = vpop.f32.mrf.mxu1 }
 0x2fe   : > { %v899_v44 = vadd.f32 %v898_v43, %v827_v42 }
 0x2ff   : > { %v900_v46 = vpop.f32.mrf.mxu1 }
 0x300   : > { %v903_v47 = vmax.f32 %v899_v44, 0.0  ;;  %v901_v48 = vadd.f32 %v900_v46, %v827_v42 }
 0x302   : > { %v917_v50 = vmul.f32 %v910_v45, %v903_v47  ;;  %v904_v51 = vmax.f32 %v901_v48, 0.0 }
 0x304   : > { %919 = vst [vmem:[%s322_s16] sm:$0xff] %v917_v50  ;;  %v918_v52 = vmul.f32 %v914_v49, %v904_v51 }
 0x306   : > { %920 = vst [vmem:[%s322_s16 + $0x8] sm:$0xff] %v918_v52 }
 0x307   : > { %1186 = shalt.err (!%p1183_p5)
}
 0x308   : > { %s1187_s30 = scalar_lea.hbm %s934_s5, 256  ;;  %s1191_s15 = scalar_lea.hbm %s1668_s7, 1024 }
 0x309   : > { %p1188_p9 = scmp.ne.s32.totalorder %s934_s5, %s1187_s30  ;;  %p1192_p4 = scmp.lt.s32.totalorder %s934_s5, %s1668_s7 }
 0x30a   : > { %p1193_p6 = scmp.lt.s32.totalorder %s1191_s15, %s1187_s30 }
 0x30b   : > { %p1189_p11 = pnand %p1188_p9, %p1687_p10 }
 0x30c   : > { %p1194_p8 = por %p1193_p6, %p1192_p4 }
 0x30d   : > { %p1190_p1 = pneg %p1189_p11 }
 0x30f   : > { %p1195_p3 = pnand %p1194_p8, %p1190_p1 }
 0x311   : > { %1198 = shalt.err (!%p1195_p3)
}
 0x312   : > { %1055 = dma.vmem_to_hbm [thread:$0]  (%p1687_p10), %s937_s10, 256, %s934_s5, %s922_s21  }
 0x313 PF: > { %p1072_p7 = scmp.ge.s32.totalorder %s1241_s27, 2  ;;  %s948_s12 = sand.u32 1, %s1229_s24  }
 0x314   : > { %p1688_p12 = scmp.ne.s32.totalorder %s1675_s8, 0  ;;  %s949_s16 = scalar_lea.sflag [#allocation6], %s948_s12 }
 0x316   : > { %p1066_p2 = pnand %p1072_p7, %p1688_p12 }
 0x318   : > { %p1067_p13 = pneg %p1066_p2 }
 0x31a   : > { %1224 = dma.done.wait (%p1067_p13), %s949_s16, 256  }
 0x31b   : > { %1226 = vsyncadd (%p1067_p13), %s949_s16, 4294967040  ;;  %s1689_s11 = sld [smem:[#allocation13_spill]]  ;;  %p21_p0 = scmp.ge.s32.totalorder %s1351_s13, 6  }
 0x31c   : > { %s1690_s24 = smov %s1233_s25  ;;  %s1691_s25 = smov %s1237_s26 }
 0x31d   : > { %s1693_s27 = smov %s1351_s13  ;;  %23 = sbr.rel (!%p21_p0) target bundleno = 8 (0x8), region = 107 }
 0x321   : > { %s1692_s26 = smov %s1689_s11 }
 0x322   :  { %954 = vsyncpa [#allocation5], 1 }
 0x323   :  { %956 = vsyncpa [#allocation5 + $0x1], 1 }
 0x324   :  { %957 = vsyncpa [#allocation8], 1 }
 0x325   :  { %958 = vsyncpa [#allocation6], 1 }
 0x326   :  { %960 = vsyncpa [#allocation6 + $0x1], 1 }

</bundles_post_ra>
